<compile_context>
chip_gen: v7x
topology: tpu7x:2x2x1
jax: 0.10.0
libtpu: 0.0.40
codegen_flags: <defaults>
</compile_context>

<pallas_src>
import functools

import jax
import jax.numpy as jnp
from jax.experimental import pallas as pl
from jax.experimental.pallas import tpu as pltpu


def _round_up(x: int, m: int) -> int:
    return ((x + m - 1) // m) * m


def _mlp_kernel(x_ref, w1_ref, b1_ref, w2_ref, b2_ref, o_ref, acc_ref):
    """One (row-tile, d_h-chunk) step of y = relu(x@W1+b1) @ W2 + b2."""
    k = pl.program_id(1)

    @pl.when(k == 0)
    def _init():
        acc_ref[...] = jnp.zeros_like(acc_ref)

    # bf16 MXU operands, f32 accumulation.  The force_float32 semantics of the
    # original module are preserved by f32 accumulate + f32 bias/ReLU/output.
    x = x_ref[...].astype(jnp.bfloat16)
    h = jnp.dot(x, w1_ref[...], preferred_element_type=jnp.float32)
    h = jnp.maximum(h + b1_ref[...], 0.0)                       # bias + ReLU (f32)
    acc_ref[...] += jnp.dot(h.astype(jnp.bfloat16), w2_ref[...],
                            preferred_element_type=jnp.float32)

    @pl.when(k == pl.num_programs(1) - 1)
    def _finalize():
        o_ref[...] = (acc_ref[...] + b2_ref[...]).astype(o_ref.dtype)


def _spec(shape, index_map, single_buffer=False):
    """BlockSpec helper; single-buffer operands whose block never changes."""
    if single_buffer:
        try:
            return pl.BlockSpec(shape, index_map, pipeline_mode=pl.Buffered(1))
        except (TypeError, AttributeError):
            pass  # older jax without pipeline_mode/Buffered -> default buffering
    return pl.BlockSpec(shape, index_map)


def prepare_tf_module_params(w1, b1, w2, b2):
    """Pad feature dims to lane multiples and cast weights to bf16 ONCE.

    Hoisted out of the per-call path so the padded/cast copies are persistent
    arrays instead of a per-forward HBM round trip.
    """
    d_in, d_h = w1.shape
    d_out = w2.shape[1]
    d_h_p = _round_up(d_h, 128)
    d_out_p = _round_up(d_out, 128)
    w1p = jnp.pad(w1.astype(jnp.bfloat16), ((0, 0), (0, d_h_p - d_h)))
    b1p = jnp.pad(b1.astype(jnp.float32), (0, d_h_p - d_h)).reshape(1, d_h_p)
    w2p = jnp.pad(w2.astype(jnp.bfloat16),
                  ((0, d_h_p - d_h), (0, d_out_p - d_out)))
    b2p = jnp.pad(b2.astype(jnp.float32), (0, d_out_p - d_out)).reshape(1, d_out_p)
    return w1p, b1p, w2p, b2p


@functools.partial(jax.jit, static_argnames=("d_out", "tm_max"))
def tf_module_forward(x, w1p, b1p, w2p, b2p, *, d_out, tm_max=512):
    """Pallas equivalent of TFModule.cpu_eval_forward for the wrapped MLP."""
    lead_shape = x.shape[:-1]
    d_in = x.shape[-1]
    rows = 1
    for s in lead_shape:
        rows *= s
    d_h_p = w1p.shape[1]
    d_out_p = w2p.shape[1]
    assert w1p.shape[0] == d_in and w2p.shape[0] == d_h_p

    x2d = x.reshape(rows, d_in)              # no padded HBM copy of x
    x_isz = jnp.dtype(x.dtype).itemsize
    w_isz = jnp.dtype(w1p.dtype).itemsize

    # ---- VMEM budget --------------------------------------------------------
    phys_vmem = 64 * 1024 * 1024             # conservative default (v7x per-TC)
    try:
        phys_vmem = int(pltpu.get_tpu_info().vmem_capacity_bytes)
    except Exception:
        pass
    vmem_cap = max(phys_vmem * 3 // 4, 32 * 1024 * 1024)   # leave headroom

    # ---- d_h chunking: weights stay resident if they fit, else tile d_h -----
    full_w_bytes = (d_in * d_h_p + d_h_p * d_out_p) * w_isz + (d_h_p + d_out_p) * 4
    if full_w_bytes <= vmem_cap // 2:
        tk = d_h_p
    else:
        per_col = 2 * ((d_in + d_out_p) * w_isz + 4)        # double-buffered slabs
        target = max(128, ((vmem_cap // 2) // per_col) // 128 * 128)
        tk, t = 128, 128
        while t <= min(target, d_h_p):                      # largest 128-multiple
            if d_h_p % t == 0:                              # dividing d_h_p
                tk = t
            t += 128
    num_k = pl.cdiv(d_h_p, tk)
    resident = num_k == 1
    # TODO(synk): very wide d_in / d_out (beyond a single VMEM slab even at
    # tk=128) would need additional grid axes; not needed for these shapes.

    # ---- row tile: fits VMEM, >=2 grid steps (dual-TC v7x), sublane-packed --
    sub = {4: 8, 2: 16, 1: 32}.get(x_isz, 8)
    w_vmem = ((1 if resident else 2)
              * ((d_in * tk + tk * d_out_p) * w_isz + tk * 4) + d_out_p * 4)
    per_row = (2 * d_in * x_isz       # double-buffered x tiles
               + 2 * d_out_p * 4      # double-buffered out tiles
               + d_out_p * 4          # f32 accumulator scratch
               + tk * 6 + d_in * 2)   # in-kernel h (f32 + bf16) and bf16 x
    tile_budget = max(vmem_cap - w_vmem, sub * per_row)
    tm_fit = max(sub, (tile_budget // per_row) // sub * sub)
    tm_two = _round_up(pl.cdiv(rows, 2), sub)               # >=2 row steps
    tm = max(sub, min(tm_max, tm_fit, tm_two, _round_up(rows, sub)))

    grid = (pl.cdiv(rows, tm), num_k)

    cost = pl.CostEstimate(
        flops=2 * rows * (d_in * d_h_p + d_h_p * d_out_p),
        transcendentals=0,
        bytes_accessed=(rows * d_in * x_isz
                        + (d_in * d_h_p + d_h_p * d_out_p) * w_isz
                        + (d_h_p + d_out_p) * 4
                        + rows * d_out_p * 4),
    )

    out2d = pl.pallas_call(
        _mlp_kernel,
        out_shape=jax.ShapeDtypeStruct((rows, d_out_p), jnp.float32),
        grid=grid,
        in_specs=[
            pl.BlockSpec((tm, d_in), lambda i, k: (i, 0)),                      # x
            _spec((d_in, tk), lambda i, k: (0, k), single_buffer=resident),     # W1
            _spec((1, tk), lambda i, k: (0, k), single_buffer=resident),        # b1
            _spec((tk, d_out_p), lambda i, k: (k, 0), single_buffer=resident),  # W2
            _spec((1, d_out_p), lambda i, k: (0, 0), single_buffer=True),       # b2
        ],
        out_specs=pl.BlockSpec((tm, d_out_p), lambda i, k: (i, 0)),
        scratch_shapes=[pltpu.VMEM((tm, d_out_p), jnp.float32)],                # acc
        compiler_params=pltpu.CompilerParams(
            dimension_semantics=("parallel", "arbitrary"),
            vmem_limit_bytes=vmem_cap,
        ),
        cost_estimate=cost,
    )(x2d, w1p, b1p, w2p, b2p)

    return out2d[:, :d_out].reshape(*lead_shape, d_out)


def _ref_forward(x, w1, b1, w2, b2):
    """Pure-f32 reference of the wrapped keras MLP (force_float32 semantics)."""
    x = x.astype(jnp.float32)
    h = jnp.maximum(x @ w1 + b1, 0.0)
    return h @ w2 + b2


def _ref_forward_bf16(x, w1, b1, w2, b2):
    """Reference that emulates the kernel's bf16-operand / f32-accumulate math."""
    xb = x.astype(jnp.float32).astype(jnp.bfloat16)
    h = jnp.dot(xb, w1.astype(jnp.bfloat16), preferred_element_type=jnp.float32)
    h = jnp.maximum(h + b1.astype(jnp.float32), 0.0)
    y = jnp.dot(h.astype(jnp.bfloat16), w2.astype(jnp.bfloat16),
                preferred_element_type=jnp.float32)
    return y + b2.astype(jnp.float32)


if __name__ == "__main__":
    # TODO(synk): TFModule's device-placement / run-queue / Parameter-export
    # machinery has no Pallas equivalent and is intentionally not modeled.
    # TODO(synk): only the representative dense-relu-dense keras MLP forward is
    # modeled; arbitrary wrapped tf.keras architectures are out of scope.

    key = jax.random.PRNGKey(0)
    k_x, k_w1, k_b1, k_w2, k_b2 = jax.random.split(key, 5)

    batch, seq, d_in, d_h, d_out = 2, 8, 32, 64, 32

    x = jax.random.normal(k_x, (batch, seq, d_in), dtype=jnp.float32)
    w1 = jax.random.normal(k_w1, (d_in, d_h), dtype=jnp.float32) * 0.1
    b1 = jax.random.normal(k_b1, (d_h,), dtype=jnp.float32) * 0.1
    w2 = jax.random.normal(k_w2, (d_h, d_out), dtype=jnp.float32) * 0.1
    b2 = jax.random.normal(k_b2, (d_out,), dtype=jnp.float32) * 0.1

    # Weight pad/cast done once, outside the hot path.
    params = prepare_tf_module_params(w1, b1, w2, b2)

    out = tf_module_forward(x, *params, d_out=d_out)
    out = jax.block_until_ready(out)

    ref_f32 = _ref_forward(x, w1, b1, w2, b2)
    ref_bf16 = _ref_forward_bf16(x, w1, b1, w2, b2)

    assert out.shape == (batch, seq, d_out)
    assert out.dtype == jnp.float32
    # Tight check against the bf16-matmul / f32-accumulate math the kernel does.
    assert jnp.allclose(out, ref_bf16, atol=2e-3, rtol=2e-3)
    # Loose check against the exact f32 (force_float32) reference.
    assert jnp.allclose(out, ref_f32, atol=5e-2, rtol=5e-2)

    print("KERNEL_OK")
</pallas_src>

<mosaic_0001>
module attributes {stable_mosaic.version = 11 : i64} {
  func.func @_mlp_kernel(%arg0: i32, %arg1: i32, %arg2: memref<8x32xf32, #tpu.memory_space<vmem>>, %arg3: memref<32x128xbf16, #tpu.memory_space<vmem>>, %arg4: memref<1x128xf32, #tpu.memory_space<vmem>>, %arg5: memref<128x128xbf16, #tpu.memory_space<vmem>>, %arg6: memref<1x128xf32, #tpu.memory_space<vmem>>, %arg7: memref<8x128xf32, #tpu.memory_space<vmem>>, %arg8: memref<8x128xf32, #tpu.memory_space<vmem>>) attributes {dimension_semantics = [#tpu.dimension_semantics<parallel>, #tpu.dimension_semantics<arbitrary>], iteration_bounds = array<i64: 2, 1>, scalar_prefetch = 0 : i64, scratch_operands = 1 : i64, tpu.core_type = #tpu.core_type<tc>, window_params = [{transform_indices = @transform_0, window_bounds = array<i64: 8, 32>}, {pipeline_mode = #tpu.pipeline_mode<synchronous>, transform_indices = @transform_1, window_bounds = array<i64: 32, 128>}, {pipeline_mode = #tpu.pipeline_mode<synchronous>, transform_indices = @transform_2, window_bounds = array<i64: 1, 128>}, {pipeline_mode = #tpu.pipeline_mode<synchronous>, transform_indices = @transform_3, window_bounds = array<i64: 128, 128>}, {pipeline_mode = #tpu.pipeline_mode<synchronous>, transform_indices = @transform_4, window_bounds = array<i64: 1, 128>}, {transform_indices = @transform_5, window_bounds = array<i64: 8, 128>}]} {
    %c0_i32 = arith.constant 0 : i32
    %0 = arith.cmpi eq, %arg1, %c0_i32 : i32
    %1 = arith.extui %0 : i1 to i32
    %c0_i32_0 = arith.constant 0 : i32
    %2 = arith.cmpi ne, %1, %c0_i32_0 : i32
    scf.if %2 {
      %cst_16 = arith.constant 0.000000e+00 : f32
      %21 = vector.broadcast %cst_16 : f32 to vector<8x128xf32>
      %c0_17 = arith.constant 0 : index
      %c0_18 = arith.constant 0 : index
      %22 = vector.load %arg8[%c0_17, %c0_18] : memref<8x128xf32, #tpu.memory_space<vmem>>, vector<8x128xf32>
      tpu.vector_store %arg8[%c0_17, %c0_18], %21 {strides = array<i32>} : memref<8x128xf32, #tpu.memory_space<vmem>>, vector<8x128xf32>,
    } else {
    }
    %c0 = arith.constant 0 : index
    %c0_1 = arith.constant 0 : index
    %3 = vector.load %arg2[%c0, %c0_1] : memref<8x32xf32, #tpu.memory_space<vmem>>, vector<8x32xf32>
    %4 = arith.truncf %3 : vector<8x32xf32> to vector<8x32xbf16>
    %c0_2 = arith.constant 0 : index
    %c0_3 = arith.constant 0 : index
    %5 = vector.load %arg3[%c0_2, %c0_3] : memref<32x128xbf16, #tpu.memory_space<vmem>>, vector<32x128xbf16>
    %cst = arith.constant dense<0.000000e+00> : vector<8x128xf32>
    %6 = tpu.matmul %4, %5, %cst {dimension_numbers = #tpu.dot_dimension_numbers<[1], [0], [0], [1], [0, 0, 1, 1], [], []>} : vector<8x32xbf16>, vector<32x128xbf16>, vector<8x128xf32> -> vector<8x128xf32>
    %c0_4 = arith.constant 0 : index
    %c0_5 = arith.constant 0 : index
    %7 = vector.load %arg4[%c0_4, %c0_5] : memref<1x128xf32, #tpu.memory_space<vmem>>, vector<1x128xf32>
    %8 = vector.broadcast %7 : vector<1x128xf32> to vector<8x128xf32>
    %9 = arith.addf %6, %8 : vector<8x128xf32>
    %cst_6 = arith.constant 0.000000e+00 : f32
    %10 = vector.broadcast %cst_6 : f32 to vector<8x128xf32>
    %11 = arith.maximumf %9, %10 : vector<8x128xf32>
    %c0_7 = arith.constant 0 : index
    %c0_8 = arith.constant 0 : index
    %12 = vector.load %arg8[%c0_7, %c0_8] : memref<8x128xf32, #tpu.memory_space<vmem>>, vector<8x128xf32>
    %13 = arith.truncf %11 : vector<8x128xf32> to vector<8x128xbf16>
    %c0_9 = arith.constant 0 : index
    %c0_10 = arith.constant 0 : index
    %14 = vector.load %arg5[%c0_9, %c0_10] : memref<128x128xbf16, #tpu.memory_space<vmem>>, vector<128x128xbf16>
    %cst_11 = arith.constant dense<0.000000e+00> : vector<8x128xf32>
    %15 = tpu.matmul %13, %14, %cst_11 {dimension_numbers = #tpu.dot_dimension_numbers<[1], [0], [0], [1], [0, 0, 1, 1], [], []>} : vector<8x128xbf16>, vector<128x128xbf16>, vector<8x128xf32> -> vector<8x128xf32>
    %16 = arith.addf %12, %15 : vector<8x128xf32>
    %c0_12 = arith.constant 0 : index
    %c0_13 = arith.constant 0 : index
    %17 = vector.load %arg8[%c0_12, %c0_13] : memref<8x128xf32, #tpu.memory_space<vmem>>, vector<8x128xf32>
    tpu.vector_store %arg8[%c0_12, %c0_13], %16 {strides = array<i32>} : memref<8x128xf32, #tpu.memory_space<vmem>>, vector<8x128xf32>,
    %c0_i32_14 = arith.constant 0 : i32
    %18 = arith.cmpi eq, %arg1, %c0_i32_14 : i32
    %19 = arith.extui %18 : i1 to i32
    %c0_i32_15 = arith.constant 0 : i32
    %20 = arith.cmpi ne, %19, %c0_i32_15 : i32
    scf.if %20 {
      %c0_16 = arith.constant 0 : index
      %c0_17 = arith.constant 0 : index
      %21 = vector.load %arg8[%c0_16, %c0_17] : memref<8x128xf32, #tpu.memory_space<vmem>>, vector<8x128xf32>
      %c0_18 = arith.constant 0 : index
      %c0_19 = arith.constant 0 : index
      %22 = vector.load %arg6[%c0_18, %c0_19] : memref<1x128xf32, #tpu.memory_space<vmem>>, vector<1x128xf32>
      %23 = vector.broadcast %22 : vector<1x128xf32> to vector<8x128xf32>
      %24 = arith.addf %21, %23 : vector<8x128xf32>
      %c0_20 = arith.constant 0 : index
      %c0_21 = arith.constant 0 : index
      %25 = vector.load %arg7[%c0_20, %c0_21] : memref<8x128xf32, #tpu.memory_space<vmem>>, vector<8x128xf32>
      tpu.vector_store %arg7[%c0_20, %c0_21], %24 {strides = array<i32>} : memref<8x128xf32, #tpu.memory_space<vmem>>, vector<8x128xf32>,
    } else {
    }
    return
  }
  func.func @transform_0(%arg0: i32, %arg1: i32) -> (i32, i32) {
    %c0_i32 = arith.constant 0 : i32
    %c0_i32_0 = arith.constant 0 : i32
    return %arg0, %c0_i32 : i32, i32
  }
  func.func @transform_1(%arg0: i32, %arg1: i32) -> (i32, i32) {
    %c0_i32 = arith.constant 0 : i32
    %c0_i32_0 = arith.constant 0 : i32
    return %c0_i32, %arg1 : i32, i32
  }
  func.func @transform_2(%arg0: i32, %arg1: i32) -> (i32, i32) {
    %c0_i32 = arith.constant 0 : i32
    %c0_i32_0 = arith.constant 0 : i32
    return %c0_i32, %arg1 : i32, i32
  }
  func.func @transform_3(%arg0: i32, %arg1: i32) -> (i32, i32) {
    %c0_i32 = arith.constant 0 : i32
    %c0_i32_0 = arith.constant 0 : i32
    return %arg1, %c0_i32 : i32, i32
  }
  func.func @transform_4(%arg0: i32, %arg1: i32) -> (i32, i32) {
    %c0_i32 = arith.constant 0 : i32
    %c0_i32_0 = arith.constant 0 : i32
    %c0_i32_1 = arith.constant 0 : i32
    return %c0_i32, %c0_i32_0 : i32, i32
  }
  func.func @transform_5(%arg0: i32, %arg1: i32) -> (i32, i32) {
    %c0_i32 = arith.constant 0 : i32
    %c0_i32_0 = arith.constant 0 : i32
    return %arg0, %c0_i32 : i32, i32
  }
}

</mosaic_0001>

<bundles_post_ra>
// kernel: tf_module_forward.1
= control target key start
LH: loop header
LB: loop body
LE: loop exit
PB: predicated region body
PF: predicated region fallthrough
CT: control target
= control target key end

     0   :  { %10 = vsyncpa [#allocation4], 0  ;;  %s1150_s0 = inlined_call_operand.hbm [shape: f32[16,32], index: 0, kind: input, shape index: {}]   ;;  %s1151_s1 = inlined_call_operand.hbm [shape: bf16[32,128], index: 1, kind: input, shape index: {}]   ;;  %s1152_s2 = inlined_call_operand.vmem [shape: f32[1,128], index: 2, kind: input, shape index: {}]   ;;  %s1153_s3 = inlined_call_operand.hbm [shape: bf16[128,128], index: 3, kind: input, shape index: {}]   ;;  %s1154_s4 = inlined_call_operand.vmem [shape: f32[1,128], index: 4, kind: input, shape index: {}]   ;;  %s1155_s5 = inlined_call_operand.vmem [shape: f32[16,128], index: 5, kind: output, shape index: {}]  }
   0x1   :  { %12 = vsyncpa [#allocation4 + $0x1], 0 }
   0x2   :  { %13 = vsyncpa [#allocation6], 0  ;;  %s954_s18 = smov 0   ;;  %s956_s19 = smov 0  }
   0x3   :  { %s958_s20 = smov 0   ;;  %s960_s21 = smov 0  }
   0x4   :  { %s962_s22 = smov 0   ;;  %s964_s23 = smov 0  }
   0x5 LB: > { %s616_s24 = sadd.s32 4294967295, %s915_s23   ;;  %p51_p0 = scmp.ne.s32.totalorder %s899_s19, %s895_s18  ;;  %s915_s23 = sphi %s964_s23, %s19_s23   ;;  %s911_s22 = sphi %s962_s22, %s1172_s22   ;;  %s907_s21 = sphi %s960_s21, %s1171_s21   ;;  %s903_s20 = sphi %s958_s20, %s1170_s20   ;;  %s899_s19 = sphi %s956_s19, %s1169_s19   ;;  %s895_s18 = sphi %s954_s18, %s1168_s18  }
   0x6   : > { %p984_p1 = scmp.eq.s32.totalorder %s616_s24, 0  ;;  %p618_p2 = scmp.ge.s32.totalorder %s915_s23, 1 }
   0x7   : > { %p187_p3 = scmp.lt.s32.totalorder %s915_s23, 3  ;;  %s917_s28 = smov [#allocation5]  }
   0x8   : > { %s1160_s25 = scalar_select %p984_p1, 1, 0 }
   0x9   : > { %p992_p4 = por %p984_p1, %p51_p0  ;;  %p996_p5 = pnand %p618_p2, %p187_p3 }
   0xa   : > { %s201_s29 = sshll.u32 %s917_s28, 4  ;;  %s918_s6 = smov [#allocation7]   ;;  %s202_s29 = int_to_ptr.vmem [resolvable:$true] %s201_s29 }
   0xb   : > { %s1161_s26 = scalar_select %p992_p4, 1, 0 }
   0xc   : > { %s1162_s27 = scalar_select %p996_p5, 1, 0 }
   0xd   : > { %p695_p6 = pneg %p996_p5  ;;  %s223_s7 = sshll.u32 %s918_s6, 4  ;;  %s1008_s7 = int_to_ptr.vmem [resolvable:$true] %s223_s7 }
   0xe   : > { %s775_s10 = scalar_lea.hbm %s1151_s1, 256 }
   0xf   : > { %p1004_p7 = pnand %p695_p6, %p984_p1  ;;  %p776_p8 = scmp.ne.s32.totalorder %s1151_s1, %s775_s10 }
  0x10   : > { %p782_p12 = scmp.lt.u32.totalorder %s775_s10, %s1151_s1 }
  0x11   : > { %p777_p9 = pneg %p1004_p7 }
  0x13   : > { %p778_p10 = pnand %p777_p9, %p776_p8 }
  0x15   : > { %p779_p11 = pneg %p778_p10 }
  0x17   : > { %p784_p13 = pnand %p782_p12, %p779_p11 }
  0x19   : > { %787 = shalt.err (!%p784_p13)
}
  0x1a   : > { %s788_s15 = scalar_lea.vmem %s202_s29, 256  ;;  %p796_p6 = scmp.lt.s32.totalorder %s202_s29, %s202_s29 }
  0x1b   : > { %p789_p0 = scmp.ne.s32.totalorder %s202_s29, %s788_s15  ;;  %p797_p1 = scmp.lt.s32.totalorder %s788_s15, %s788_s15 }
  0x1d   : > { %p791_p2 = pnand %p789_p0, %p777_p9  ;;  %p798_p4 = por %p797_p1, %p796_p6 }
  0x1f   : > { %p792_p3 = pneg %p791_p2 }
  0x21   : > { %p799_p5 = pnand %p798_p4, %p792_p3 }
  0x23   : > { %802 = shalt.err (!%p799_p5)
}
  0x24   : > { %s919_s16 = smov 64   ;;  %s920_s17 = smov 4  }
  0x25   : > { %698 = dma.hbm_to_vmem [thread:$0]  (!%p1004_p7), %s1151_s1, 256, %s202_s29, [#allocation6], %s919_s16, %s919_s16, %s920_s17  }
  0x26   : > { %s803_s8 = scalar_lea.hbm %s1153_s3, 1024 }
  0x27   : > { %p804_p8 = scmp.ne.s32.totalorder %s1153_s3, %s803_s8  ;;  %p810_p5 = scmp.lt.u32.totalorder %s803_s8, %s1153_s3 }
  0x29   : > { %p806_p1 = pnand %p804_p8, %p777_p9 }
  0x2b   : > { %p807_p4 = pneg %p806_p1 }
  0x2d   : > { %p812_p10 = pnand %p810_p5, %p807_p4 }
  0x2f   : > { %815 = shalt.err (!%p812_p10)
}
  0x30   : > { %s816_s29 = scalar_lea.vmem %s1008_s7, 1024  ;;  %p824_p0 = scmp.lt.s32.totalorder %s1008_s7, %s1008_s7 }
  0x31   : > { %p817_p11 = scmp.ne.s32.totalorder %s1008_s7, %s816_s29  ;;  %p825_p2 = scmp.lt.s32.totalorder %s816_s29, %s816_s29 }
  0x33   : > { %p819_p12 = pnand %p817_p11, %p777_p9  ;;  %p826_p3 = por %p825_p2, %p824_p0 }
  0x35   : > { %p820_p13 = pneg %p819_p12 }
  0x37   : > { %p827_p6 = pnand %p826_p3, %p820_p13 }
  0x39   : > { %830 = shalt.err (!%p827_p6)
}
  0x3a   : > { %701 = dma.hbm_to_vmem [thread:$0]  (!%p1004_p7), %s1153_s3, 1024, %s1008_s7, [#allocation6], %s919_s16, %s919_s16, %s920_s17  }
  0x3b   : > { %s31_s15 = sadd.s32 1, %s911_s22  ;;  %s38_s18 = sadd.s32 1, %s903_s20 }
  0x3c   : > { %p33_p9 = scmp.ge.s32.totalorder %s31_s15, 2  ;;  %p45_p8 = scmp.ne.s32.totalorder %s903_s20, %s899_s19 }
  0x3d   : > { %p46_p1 = scmp.eq.s32.totalorder %s915_s23, 0  ;;  %p708_p4 = scmp.lt.s32.totalorder %s915_s23, 2 }
  0x3e   : > { %s1174_s15 = smov (%p33_p9, %s31_s15), 0  ;;  %s240_s30 = sand.u32 1, %s903_s20  }
  0x3f   : > { %p47_p5 = por %p46_p1, %p45_p8  ;;  %s35_s24 = ssub.s32 %s911_s22, %s1174_s15 }
  0x40   : > { %p36_p10 = scmp.eq.s32.totalorder %s35_s24, 0  ;;  %s623_s28 = sshll.u32 %s240_s30, 3 }
  0x41   : > { %s624_s6 = sshll.u32 %s911_s22, 7  ;;  %s244_s17 = scalar_lea.vmem [#allocation3], %s623_s28 }
  0x42   : > { %s1070_s8 = scalar_select %p36_p10, %s903_s20, %s38_s18  }
  0x43   : > { %s1075_s16 = scalar_lea.hbm %s1150_s0, %s624_s6  ;;  %s251_s10 = sshll.u32 %s244_s17, 4  ;;  %s1077_s10 = int_to_ptr.vmem [resolvable:$true] %s251_s10 }
  0x44   : > { %p1081_p7 = pnand %p708_p4, %p47_p5  ;;  %s241_s12 = scalar_lea.sflag [#allocation4], %s240_s30 }
  0x45   : > { %s831_s29 = scalar_lea.hbm %s1075_s16, 128  ;;  %s836_s18 = scalar_lea.hbm %s1150_s0, 256 }
  0x46   : > { %p832_p11 = scmp.ne.s32.totalorder %s1075_s16, %s831_s29  ;;  %p833_p12 = pneg %p1081_p7 }
  0x47   : > { %p837_p2 = scmp.lt.u32.totalorder %s1075_s16, %s1150_s0  ;;  %p838_p3 = scmp.lt.u32.totalorder %s836_s18, %s831_s29 }
  0x48   : > { %p834_p13 = pnand %p833_p12, %p832_p11  ;;  %p840_p9 = scmp.lt.u32.totalorder %s831_s29, %s1075_s16 }
  0x49   : > { %p839_p6 = por %p838_p3, %p837_p2 }
  0x4a   : > { %p835_p0 = pneg %p834_p13 }
  0x4b   : > { %p841_p8 = por %p840_p9, %p839_p6 }
  0x4d   : > { %p842_p1 = pnand %p841_p8, %p835_p0 }
  0x4f   : > { %845 = shalt.err (!%p842_p1)
}
  0x50   : > { %s846_s30 = scalar_lea.vmem %s1077_s10, 128  ;;  %s921_s6 = smov [#allocation3]  }
  0x51   : > { %p847_p4 = scmp.ne.s32.totalorder %s1077_s10, %s846_s30  ;;  %s851_s9 = sshll.u32 %s921_s6, 4  ;;  %s852_s9 = int_to_ptr.vmem [resolvable:$false] %s851_s9 }
  0x52   : > { %s853_s7 = scalar_lea.vmem %s852_s9, 256  ;;  %p854_p11 = scmp.lt.s32.totalorder %s1077_s10, %s852_s9 }
  0x53   : > { %p849_p5 = pnand %p847_p4, %p833_p12  ;;  %p855_p13 = scmp.lt.s32.totalorder %s853_s7, %s846_s30 }
  0x55   : > { %p850_p10 = pneg %p849_p5  ;;  %p856_p2 = por %p855_p13, %p854_p11 }
  0x57   : > { %p857_p3 = pnand %p856_p2, %p850_p10 }
  0x59   : > { %860 = shalt.err (!%p857_p3)
}
  0x5a   : > { %705 = dma.hbm_to_vmem [thread:$0]  (!%p1081_p7), %s1075_s16, 128, %s1077_s10, %s241_s12  }
  0x5b   : > { %p1165_p0 = scmp.ne.s32.totalorder %s1162_s27, 0 }
  0x5c   : > { %s262_s17 = sand.u32 (!%p1165_p0), 1, %s899_s19   ;;  %p1166_p12 = scmp.ne.s32.totalorder (!%p1165_p0), %s1161_s26, 0 }
  0x5d   : > { %260 = sbr.rel (%p1165_p0) target bundleno = 547 (0x223), region = 40  ;;  %s626_s29 = sshll.u32 (!%p1165_p0), %s262_s17, 3 }
  0x5e   : > { %s263_s13 = scalar_lea.sflag (!%p1165_p0), [#allocation4], %s262_s17  ;;  %s266_s14 = scalar_lea.vmem (!%p1165_p0), [#allocation3], %s626_s29 }
  0x64   : > { %886 = dma.done.wait (%p1166_p12), %s263_s13, 128  }
  0x65   : > { %888 = vsyncadd (%p1166_p12), %s263_s13, 4294967168  ;;  %p1167_p6 = scmp.ne.s32.totalorder %s1160_s25, 0 }
  0x67   : > { %890 = dma.done.wait (%p1167_p6), [#allocation6], 1280  }
  0x68   : > { %892 = vsyncadd (%p1167_p6), [#allocation6], 4294966016  ;;  %v922_v0 = vmov 0.0   ;;  %vm923_vm0 = vmmov 0   ;;  %v765_v1 = vld [vmem:[#allocation5] sm:$0xff]   ;;  %v766_v2 = vld [vmem:[#allocation5 + $0x8] sm:$0xff]  }
  0x69   : > { %657 = vmatprep.subr.bf16.mxu0 %v922_v0  ;;  %661 = vmatprep.mubr.msk.bf16.mxu0 %vm923_vm0, %v922_v0  ;;  %v317_v3 = vld [vmem:[%s266_s14] sm:$0xff]  ;;  %vm342_vm1 = vcmask 261120   ;;  %v769_v7 = vld [vmem:[#allocation7 + $0x10] sm:$0xff]   ;;  %v770_v8 = vld [vmem:[#allocation7 + $0x18] sm:$0xff]   ;;  %p307_p7 = scmp.lt.s32.totalorder %s907_s21, 1 }
  0x6a   : > { %665 = vmatprep.subr.bf16.mxu1 %v922_v0  ;;  %681 = vmatprep.mubr.msk.bf16.mxu1 %vm923_vm0, %v922_v0  ;;  %v767_v4 = vld [vmem:[#allocation7] sm:$0xff]   ;;  %v318_v5 = vpack.c.bf16 %v317_v3, %v317_v3  ;;  %v768_v6 = vld [vmem:[#allocation7 + $0x8] sm:$0xff]   ;;  %v773_v11 = vld [vmem:[#allocation7 + $0x30] sm:$0xff]  }
  0x6b   : > { %658 = vmatpush3.bf16.msra.mxu0 %v765_v1  ;;  %666 = vmatpush3.bf16.msra.mxu1 %v767_v4  ;;  %v771_v9 = vld [vmem:[#allocation7 + $0x20] sm:$0xff]   ;;  %v772_v10 = vld [vmem:[#allocation7 + $0x28] sm:$0xff]   ;;  %v774_v12 = vld [vmem:[#allocation7 + $0x38] sm:$0xff]   ;;  %s1176_s21 = smov (!%p307_p7, %s907_s21), 1 }
  0x6c   : > { %659 = vmatprep.subr.bf16.mxu0 %v922_v0  ;;  %667 = vmatprep.subr.bf16.mxu1 %v922_v0  ;;  %v630_v13 = vld [vmem:[%s1152_s2] ss:$0 sm:$0xff]  ;;  %s629_s27 = sshll.u32 %s1176_s21, 3 }
  0x6d   : > { %v642_v21 = vld [vmem:[%s1154_s4] ss:$0 sm:$0xff]  ;;  %s310_s18 = scalar_lea.vmem %s1155_s5, %s629_s27 }
  0x6f   : > { %660 = vmatpush3.bf16.msra.mxu0 %v766_v2  ;;  %668 = vmatpush3.bf16.msra.mxu1 %v768_v6 }
  0x70   : > { %669 = vmatprep.subr.bf16.mxu1 %v922_v0 }
  0x72   : > { %662 = vmatmul.mubr.msk.bf16.vlgmr.msra.gmra.mrb[0].mxu0 %vm342_vm1, %v318_v5 }
  0x73   : > { %670 = vmatpush3.bf16.msra.mxu1 %v769_v7 }
  0x74   : > { %671 = vmatprep.subr.bf16.mxu1 %v922_v0 }
  0x77   : > { %672 = vmatpush3.bf16.msra.mxu1 %v770_v8 }
  0x78   : > { %673 = vmatprep.subr.bf16.mxu1 %v922_v0 }
  0x7b   : > { %674 = vmatpush3.bf16.msra.mxu1 %v771_v9 }
  0x7c   : > { %675 = vmatprep.subr.bf16.mxu1 %v922_v0 }
  0x7f   : > { %676 = vmatpush3.bf16.msra.mxu1 %v772_v10 }
  0x80   : > { %677 = vmatprep.subr.bf16.mxu1 %v922_v0 }
  0x83   : > { %678 = vmatpush3.bf16.msra.mxu1 %v773_v11 }
  0x84   : > { %679 = vmatprep.subr.bf16.mxu1 %v922_v0 }
  0x87   : > { %680 = vmatpush3.bf16.msra.mxu1 %v774_v12 }
 0x145   : > { %v380_v14 = vpop.f32.mrb[0].mxu0 }
 0x146   : > { %v381_v15 = vadd.f32 %v630_v13, %v380_v14  ;;  %v663_v16 = vpop.f32.mrb[1].mxu0 }
 0x147   : > { %v383_v17 = vpop.f32.mrb[2].mxu0 }
 0x148   : > { %v386_v18 = vmax.f32 %v381_v15, 0.0  ;;  %v664_v19 = vpop.f32.mrb[3].mxu0 }
 0x14a   : > { %v388_v20 = vpack.c.bf16 %v386_v18, %v386_v18 }
 0x14c   : > { %682 = vmatmul.mubr.bf16.vlgmr.msra.gmra.mrb[0].mxu1 %v388_v20 }
 0x21f   : > { %v487_v22 = vpop.f32.mrb[0].mxu1 }
 0x220   : > { %v506_v23 = vadd.f32 %v642_v21, %v487_v22  ;;  %v683_v24 = vpop.f32.mrb[1].mxu1 }
 0x221   : > { %v490_v25 = vpop.f32.mrb[2].mxu1 }
 0x222   : > { %507 = vst [vmem:[%s310_s18] sm:$0xff] %v506_v23  ;;  %v684_v26 = vpop.f32.mrb[3].mxu1 }
 0x223 PF: > { %s19_s23 = sadd.s32 1, %s915_s23   ;;  %s1168_s18 = smov %s899_s19 }
 0x224   : > { %p16_p9 = scmp.ge.s32.totalorder %s19_s23, 4   ;;  %s1169_s19 = smov %s903_s20 }
 0x225   : > { %s1170_s20 = smov %s1070_s8  ;;  %s1171_s21 = smov %s911_s22 }
 0x226   : > { %s1172_s22 = smov %s1174_s15  ;;  %18 = sbr.rel (!%p16_p9) target bundleno = 5 (0x5), region = 101 }
 0x22d   :  { %527 = vsyncpa [#allocation4], 1 }
 0x22e   :  { %529 = vsyncpa [#allocation4 + $0x1], 1 }
 0x22f   :  { %530 = vsyncpa [#allocation6], 1 }

</bundles_post_ra>
